<compile_context>
chip_gen: v7x
topology: tpu7x:2x2x1
jax: 0.10.0
libtpu: 0.0.40
codegen_flags: <defaults>
</compile_context>

<pallas_src>
import numpy as np

import jax
import jax.numpy as jnp
from jax.experimental import pallas as pl
from jax.experimental.pallas import tpu as pltpu


def _layer1_kernel(x_ref, w1_ref, b1_ref, h_ref):
    # h = tanh(x @ w1 + b1); x is cast to the weight dtype (bf16) for the MXU,
    # accumulation + bias + tanh stay in f32, result stored in h_ref.dtype.
    x = x_ref[...].astype(w1_ref.dtype)
    acc = jnp.dot(x, w1_ref[...], preferred_element_type=jnp.float32)
    h_ref[...] = jnp.tanh(acc + b1_ref[...]).astype(h_ref.dtype)


def _layer2_kernel(h_ref, w2_ref, b2_ref, o_ref):
    # o_tile = h @ w2_tile + b2_tile; one lane-dense N tile per grid step.
    acc = jnp.dot(h_ref[...], w2_ref[...], preferred_element_type=jnp.float32)
    o_ref[...] = (acc + b2_ref[...]).astype(o_ref.dtype)


def _pick_tile_n(out_dim: int) -> int:
    """Lane-dense output tile (multiple of 128) that divides out_dim if possible."""
    if out_dim <= 512:
        return out_dim
    for tn in (512, 1024, 256, 128):
        if out_dim % tn == 0:
            return tn
    return 512  # non-dividing fallback: last tile is partial (masked stores)


def prefix_mlp_pallas(x, w1, b1, w2, b2, *, out_dtype=jnp.float32):
    """(M, token_dim) -> (M, out_dim) tanh-MLP.  Weights may be bf16; acc is f32."""
    M, D = x.shape
    H = w1.shape[1]
    out_dim = w2.shape[1]

    # Pad M up to a multiple of 128 so the MXU runs at full height.
    m_pad = max(128, -(-M // 128) * 128)
    if m_pad != M:
        x = jnp.pad(x, ((0, m_pad - M), (0, 0)))

    h_dtype = w2.dtype                 # keep layer-1 activation in the MXU dtype
    h_isize = np.dtype(h_dtype).itemsize
    o_isize = np.dtype(out_dtype).itemsize
    vmem_full = lambda: pl.BlockSpec(memory_space=pltpu.VMEM)

    # ---- layer 1: h = tanh(x @ w1 + b1)  (small single block, runs once) ----
    l1_bytes = int(x.size * x.dtype.itemsize + w1.size * w1.dtype.itemsize
                   + b1.size * b1.dtype.itemsize + m_pad * H * h_isize)
    h = pl.pallas_call(
        _layer1_kernel,
        out_shape=jax.ShapeDtypeStruct((m_pad, H), h_dtype),
        in_specs=[vmem_full(), vmem_full(), vmem_full()],
        out_specs=vmem_full(),
        compiler_params=pltpu.CompilerParams(
            vmem_limit_bytes=int(min(max(2 * l1_bytes, 16 << 20), 48 << 20))),
        cost_estimate=pl.CostEstimate(
            flops=2 * m_pad * D * H,
            transcendentals=m_pad * H,
            bytes_accessed=l1_bytes),
    )(x, w1, b1)

    # ---- layer 2: out = h @ w2 + b2, streaming w2 over lane-dense N tiles ----
    tn = _pick_tile_n(out_dim)
    grid = (pl.cdiv(out_dim, tn),)

    buf_bytes = 2 * (m_pad * H * h_isize          # resident h (double-buffered est.)
                     + H * tn * w2.dtype.itemsize  # streamed w2 tile
                     + tn * b2.dtype.itemsize      # bias tile
                     + m_pad * tn * o_isize)       # output tile
    vmem_limit = int(min(max(buf_bytes + (4 << 20), 16 << 20), 48 << 20))

    out = pl.pallas_call(
        _layer2_kernel,
        out_shape=jax.ShapeDtypeStruct((m_pad, out_dim), out_dtype),
        grid_spec=pltpu.PrefetchScalarGridSpec(
            num_scalar_prefetch=0,
            grid=grid,
            in_specs=[
                pl.BlockSpec((m_pad, H), lambda j: (0, 0)),   # h: resident across tiles
                pl.BlockSpec((H, tn), lambda j: (0, j)),      # streamed weight tile
                pl.BlockSpec((1, tn), lambda j: (0, j)),      # matching bias tile
            ],
            out_specs=pl.BlockSpec((m_pad, tn), lambda j: (0, j)),
        ),
        compiler_params=pltpu.CompilerParams(
            dimension_semantics=("parallel",),   # megacore: split N tiles on v7x
            vmem_limit_bytes=vmem_limit),
        cost_estimate=pl.CostEstimate(
            flops=2 * m_pad * H * out_dim,
            transcendentals=0,
            bytes_accessed=int(w2.size * w2.dtype.itemsize
                               + m_pad * H * h_isize
                               + b2.size * b2.dtype.itemsize
                               + m_pad * out_dim * o_isize)),
    )(h, w2, b2)

    return out[:M]


def prefix_encoder_forward(prefix, params, prefix_projection=True):
    """Mirrors PrefixEncoder.forward.

    prefix: (batch, num_virtual_tokens) int32 indices into the virtual-token table.
    """
    if prefix_projection:
        emb = params["embedding"]                          # (T_virt, token_dim) f32
        tokens = jnp.take(emb, prefix, axis=0)             # gather glue (outside kernel)
        B, T, D = tokens.shape
        x = tokens.reshape(B * T, D).astype(jnp.float32)
        out = prefix_mlp_pallas(x, params["w1"], params["b1"],
                                params["w2"], params["b2"])
        return out.reshape(B, T, -1)
    # Non-projection branch: pure embedding lookup, no matmul hot path.
    return jnp.take(params["embedding_flat"], prefix, axis=0)


def init_params(key, num_virtual_tokens, token_dim, encoder_hidden_size, num_layers):
    k0, k1, k2, k3, k4, k5 = jax.random.split(key, 6)
    out_dim = num_layers * 2 * token_dim
    scale1 = 1.0 / jnp.sqrt(token_dim)
    scale2 = 1.0 / jnp.sqrt(encoder_hidden_size)
    return {
        # Projection-branch params; weights stored bf16 (HBM-traffic / MXU win),
        # biases + embedding in f32, matmul accumulation in f32.
        "embedding": jax.random.normal(k0, (num_virtual_tokens, token_dim), jnp.float32),
        "w1": jax.random.uniform(k1, (token_dim, encoder_hidden_size), jnp.float32,
                                 -scale1, scale1).astype(jnp.bfloat16),
        "b1": jax.random.uniform(k2, (1, encoder_hidden_size), jnp.float32,
                                 -scale1, scale1),
        "w2": jax.random.uniform(k3, (encoder_hidden_size, out_dim), jnp.float32,
                                 -scale2, scale2).astype(jnp.bfloat16),
        "b2": jax.random.uniform(k4, (1, out_dim), jnp.float32, -scale2, scale2),
        # Non-projection branch param.
        "embedding_flat": jax.random.normal(k5, (num_virtual_tokens, out_dim), jnp.float32),
    }


if __name__ == "__main__":
    # Small, forward-consistent shapes.
    batch = 2
    num_virtual_tokens = 8
    token_dim = 32
    encoder_hidden_size = 32
    num_layers = 2          # output last dim = 2 * num_layers * token_dim = 128

    key = jax.random.PRNGKey(0)
    params = init_params(key, num_virtual_tokens, token_dim,
                         encoder_hidden_size, num_layers)

    # prefix input: each row is the virtual-token index sequence [0..T-1]
    prefix = jnp.tile(jnp.arange(num_virtual_tokens, dtype=jnp.int32)[None, :],
                      (batch, 1))

    out = prefix_encoder_forward(prefix, params, prefix_projection=True)
    out = jax.block_until_ready(out)
    assert out.shape == (batch, num_virtual_tokens, 2 * num_layers * token_dim)

    # Plain-JAX reference mirroring the kernel's dtype handling
    # (bf16 weights / bf16 layer-1 activation, f32 accumulation).
    tokens = jnp.take(params["embedding"], prefix, axis=0).astype(jnp.float32)
    xb = tokens.astype(jnp.bfloat16).astype(jnp.float32)
    w1f = params["w1"].astype(jnp.float32)
    w2f = params["w2"].astype(jnp.float32)
    h_ref = jnp.tanh(xb @ w1f + params["b1"][0])
    hb = h_ref.astype(jnp.bfloat16).astype(jnp.float32)
    ref = hb @ w2f + params["b2"][0]

    assert jnp.allclose(out, ref, atol=2e-2, rtol=2e-2), (
        "max abs err = %f" % float(jnp.max(jnp.abs(out - ref))))
    print("KERNEL_OK")
</pallas_src>

<mosaic_0001>
module attributes {stable_mosaic.version = 11 : i64} {
  func.func @_layer1_kernel(%arg0: memref<128x32xf32, #tpu.memory_space<vmem>>, %arg1: memref<32x32xbf16, #tpu.memory_space<vmem>>, %arg2: memref<1x32xf32, #tpu.memory_space<vmem>>, %arg3: memref<128x32xbf16, #tpu.memory_space<vmem>>) attributes {dimension_semantics = [], scalar_prefetch = 0 : i64, scratch_operands = 0 : i64, tpu.core_type = #tpu.core_type<tc>} {
    %c0 = arith.constant 0 : index
    %c0_0 = arith.constant 0 : index
    %0 = vector.load %arg0[%c0, %c0_0] : memref<128x32xf32, #tpu.memory_space<vmem>>, vector<128x32xf32>
    %1 = arith.truncf %0 : vector<128x32xf32> to vector<128x32xbf16>
    %c0_1 = arith.constant 0 : index
    %c0_2 = arith.constant 0 : index
    %2 = vector.load %arg1[%c0_1, %c0_2] : memref<32x32xbf16, #tpu.memory_space<vmem>>, vector<32x32xbf16>
    %cst = arith.constant dense<0.000000e+00> : vector<128x32xf32>
    %3 = tpu.matmul %1, %2, %cst {dimension_numbers = #tpu.dot_dimension_numbers<[1], [0], [0], [1], [0, 0, 1, 1], [], []>} : vector<128x32xbf16>, vector<32x32xbf16>, vector<128x32xf32> -> vector<128x32xf32>
    %c0_3 = arith.constant 0 : index
    %c0_4 = arith.constant 0 : index
    %4 = vector.load %arg2[%c0_3, %c0_4] : memref<1x32xf32, #tpu.memory_space<vmem>>, vector<1x32xf32>
    %5 = vector.broadcast %4 : vector<1x32xf32> to vector<128x32xf32>
    %6 = arith.addf %3, %5 : vector<128x32xf32>
    %7 = math.tanh %6 : vector<128x32xf32>
    %8 = arith.truncf %7 : vector<128x32xf32> to vector<128x32xbf16>
    %c0_5 = arith.constant 0 : index
    %c0_6 = arith.constant 0 : index
    %9 = vector.load %arg3[%c0_5, %c0_6] : memref<128x32xbf16, #tpu.memory_space<vmem>>, vector<128x32xbf16>
    tpu.vector_store %arg3[%c0_5, %c0_6], %8 {strides = array<i32>} : memref<128x32xbf16, #tpu.memory_space<vmem>>, vector<128x32xbf16>,
    return
  }
}

</mosaic_0001>

<bundles_post_ra>
// kernel: tpu_custom_call.1
= control target key start
LH: loop header
LB: loop body
LE: loop exit
PB: predicated region body
PF: predicated region fallthrough
CT: control target
= control target key end

     0   :  { %vm62_vm0 = vcmask 261120   ;;  %vm264_vm1 = vcmask 257024   ;;  %s545_s1 = inlined_call_operand.vmem [shape: bf16[32,32], index: 1, kind: input, shape index: {}]   ;;  %s546_s0 = inlined_call_operand.vmem [shape: f32[128,32], index: 0, kind: input, shape index: {}]   ;;  %s547_s2 = inlined_call_operand.vmem [shape: f32[1,32], index: 2, kind: input, shape index: {}]   ;;  %s548_s3 = inlined_call_operand.vmem [shape: bf16[128,32], index: 3, kind: output, shape index: {}]  }
   0x1   :  { %v362_v0 = vld [vmem:[%s545_s1] sm:$0xff]   ;;  %v363_v1 = vld [vmem:[%s545_s1 + $0x8] sm:$0xff]   ;;  %v17_v7 = vld [vmem:[%s546_s0 + $0x10] sm:$0xff] }
   0x2   :  { %338 = vmatprep.subr.bf16.mxu0 %v362_v0  ;;  %358 = vmatprep.subr.bf16.mxu1 %v362_v0  ;;  %v15_v2 = vld [vmem:[%s546_s0] sm:$0xff]  ;;  %v16_v3 = vld [vmem:[%s546_s0 + $0x8] sm:$0xff]  ;;  %v18_v8 = vld [vmem:[%s546_s0 + $0x18] sm:$0xff] }
   0x3   :  { %v23_v4 = vld [vmem:[%s546_s0 + $0x40] sm:$0xff]  ;;  %339 = vmatpush3.bf16.msra.mxu0 %v362_v0  ;;  %360 = vmatpush3.bf16.msra.mxu1 %v362_v0  ;;  %v31_v5 = vpack.c.bf16 %v16_v3, %v15_v2  ;;  %v24_v6 = vld [vmem:[%s546_s0 + $0x48] sm:$0xff]  ;;  %v25_v10 = vld [vmem:[%s546_s0 + $0x50] sm:$0xff]  ;;  %v32_v16 = vpack.c.bf16 %v18_v8, %v17_v7 }
   0x4   :  { %340 = vmatprep.subr.bf16.mxu0 %v363_v1  ;;  %359 = vmatprep.subr.bf16.mxu1 %v363_v1  ;;  %v35_v9 = vpack.c.bf16 %v24_v6, %v23_v4  ;;  %v26_v11 = vld [vmem:[%s546_s0 + $0x58] sm:$0xff]  ;;  %v19_v12 = vld [vmem:[%s546_s0 + $0x20] sm:$0xff]  ;;  %v20_v13 = vld [vmem:[%s546_s0 + $0x28] sm:$0xff] }
   0x5   :  { %342 = vmatprep.mubr.msk.bf16.mxu0 %vm62_vm0, %v31_v5  ;;  %v27_v14 = vld [vmem:[%s546_s0 + $0x60] sm:$0xff]  ;;  %v28_v15 = vld [vmem:[%s546_s0 + $0x68] sm:$0xff]  ;;  %v36_v17 = vpack.c.bf16 %v26_v11, %v25_v10  ;;  %v33_v18 = vpack.c.bf16 %v20_v13, %v19_v12  ;;  %v21_v20 = vld [vmem:[%s546_s0 + $0x30] sm:$0xff] }
   0x6   :  { %350 = vmatprep.mubr.msk.bf16.mxu1 %vm62_vm0, %v35_v9  ;;  %v37_v19 = vpack.c.bf16 %v28_v15, %v27_v14  ;;  %v22_v21 = vld [vmem:[%s546_s0 + $0x38] sm:$0xff]  ;;  %v29_v22 = vld [vmem:[%s546_s0 + $0x70] sm:$0xff]  ;;  %v285_v26 = vld [vmem:[%s547_s2] ss:$0 sm:$0xff] }
   0x7   :  { %341 = vmatpush3.bf16.msra.mxu0 %v363_v1  ;;  %361 = vmatpush3.bf16.msra.mxu1 %v363_v1  ;;  %v30_v23 = vld [vmem:[%s546_s0 + $0x78] sm:$0xff]  ;;  %v34_v24 = vpack.c.bf16 %v22_v21, %v21_v20 }
   0x8   :  { %v38_v25 = vpack.c.bf16 %v30_v23, %v29_v22 }
   0xa   :  { %343 = vmatmul.mubr.msk.bf16.vlgmr.msra.gmra.mrb[0].mxu0 %vm62_vm0, %v32_v16  ;;  %351 = vmatmul.mubr.msk.bf16.vlgmr.msra.gmra.mrb[0].mxu1 %vm62_vm0, %v36_v17 }
   0xb   :  { %346 = vmatprep.mubr.msk.bf16.mxu0 %vm62_vm0, %v33_v18  ;;  %354 = vmatprep.mubr.msk.bf16.mxu1 %vm62_vm0, %v37_v19 }
  0x12   :  { %347 = vmatmul.mubr.msk.bf16.gmra.mrb[4].mxu0 %vm62_vm0, %v34_v24  ;;  %355 = vmatmul.mubr.msk.bf16.gmra.mrb[4].mxu1 %vm62_vm0, %v38_v25 }
  0xdd   :  { %v344_v27 = vpop.f32.mrb[0].mxu0  ;;  %v352_v28 = vpop.f32.mrb[0].mxu1 }
  0xde   :  { %v130_v29 = vadd.f32 %v344_v27, %v285_v26  ;;  %v162_v30 = vadd.f32 %v352_v28, %v285_v26  ;;  %v121_v31 = vpop.f32.mrb[1].mxu0  ;;  %v153_v32 = vpop.f32.mrb[1].mxu1 }
  0xdf   :  { %v122_v33 = vadd.f32 %v285_v26, %v121_v31  ;;  %v154_v34 = vadd.f32 %v285_v26, %v153_v32  ;;  %v345_v35 = vpop.f32.mrb[2].mxu0  ;;  %v353_v36 = vpop.f32.mrb[2].mxu1 }
  0xe0   :  { %364 = vtanh.f32 %v130_v29  ;;  %v133_v37 = vadd.f32 %v345_v35, %v285_v26  ;;  %v124_v38 = vpop.f32.mrb[3].mxu0  ;;  %v156_v39 = vpop.f32.mrb[3].mxu1  ;;  %v165_v40 = vadd.f32 %v353_v36, %v285_v26 }
  0xe1   :  { %366 = vtanh.f32 %v162_v30  ;;  %v125_v41 = vadd.f32 %v285_v26, %v124_v38  ;;  %v157_v42 = vadd.f32 %v285_v26, %v156_v39 }
  0xe2   :  { %368 = vtanh.f32 %v122_v33 }
  0xe3   :  { %370 = vtanh.f32 %v154_v34 }
  0xe4   :  { %372 = vtanh.f32 %v133_v37 }
  0xe5   :  { %374 = vtanh.f32 %v165_v40  ;;  %v348_v43 = vpop.f32.mrb[4].mxu0  ;;  %v356_v44 = vpop.f32.mrb[4].mxu1 }
  0xe6   :  { %376 = vtanh.f32 %v125_v41  ;;  %v146_v45 = vadd.f32 %v348_v43, %v285_v26  ;;  %v178_v46 = vadd.f32 %v356_v44, %v285_v26  ;;  %v137_v47 = vpop.f32.mrb[5].mxu0  ;;  %v169_v48 = vpop.f32.mrb[5].mxu1 }
  0xe7   :  { %378 = vtanh.f32 %v157_v42  ;;  %v138_v49 = vadd.f32 %v285_v26, %v137_v47  ;;  %v170_v50 = vadd.f32 %v285_v26, %v169_v48  ;;  %v349_v51 = vpop.f32.mrb[6].mxu0  ;;  %v357_v52 = vpop.f32.mrb[6].mxu1 }
  0xe8   :  { %380 = vtanh.f32 %v146_v45  ;;  %v149_v53 = vadd.f32 %v349_v51, %v285_v26  ;;  %v140_v54 = vpop.f32.mrb[7].mxu0  ;;  %v172_v55 = vpop.f32.mrb[7].mxu1  ;;  %v181_v56 = vadd.f32 %v357_v52, %v285_v26 }
  0xe9   :  { %382 = vtanh.f32 %v178_v46  ;;  %v141_v58 = vadd.f32 %v285_v26, %v140_v54  ;;  %v173_v61 = vadd.f32 %v285_v26, %v172_v55 }
  0xea   :  { %v365_v57 = vpop.eup %364  ;;  %384 = vtanh.f32 %v138_v49 }
  0xeb   :  { %v367_v59 = vpop.eup %366  ;;  %v314_v60 = vpack.c.bf16 %v365_v57, %v365_v57  ;;  %386 = vtanh.f32 %v170_v50 }
  0xec   :  { %v369_v62 = vpop.eup %368  ;;  %v322_v63 = vpack.c.bf16 %v367_v59, %v367_v59  ;;  %388 = vtanh.f32 %v149_v53 }
  0xed   :  { %v371_v0 = vpop.eup %370  ;;  %267 = vst.msk [vmem:[%s548_s3 + $0x8] sm:$0xf] %vm264_vm1, %v314_v60  ;;  %v312_v1 = vpack.c.bf16 %v369_v62, %v369_v62  ;;  %390 = vtanh.f32 %v181_v56 }
  0xee   :  { %v373_v2 = vpop.eup %372  ;;  %275 = vst.msk [vmem:[%s548_s3 + $0x28] sm:$0xf] %vm264_vm1, %v322_v63  ;;  %v320_v3 = vpack.c.bf16 %v371_v0, %v371_v0  ;;  %392 = vtanh.f32 %v141_v58 }
  0xef   :  { %v375_v4 = vpop.eup %374  ;;  %265 = vst.msk [vmem:[%s548_s3] sm:$0xf] %vm264_vm1, %v312_v1  ;;  %v315_v5 = vpack.c.bf16 %v373_v2, %v373_v2  ;;  %394 = vtanh.f32 %v173_v61 }
  0xf0   :  { %v377_v6 = vpop.eup %376  ;;  %273 = vst.msk [vmem:[%s548_s3 + $0x20] sm:$0xf] %vm264_vm1, %v320_v3  ;;  %v323_v7 = vpack.c.bf16 %v375_v4, %v375_v4 }
  0xf1   :  { %v379_v8 = vpop.eup %378  ;;  %268 = vst.msk [vmem:[%s548_s3 + $0xc] sm:$0xf] %vm264_vm1, %v315_v5  ;;  %v313_v9 = vpack.c.bf16 %v377_v6, %v377_v6 }
  0xf2   :  { %v381_v10 = vpop.eup %380  ;;  %276 = vst.msk [vmem:[%s548_s3 + $0x2c] sm:$0xf] %vm264_vm1, %v323_v7  ;;  %v321_v11 = vpack.c.bf16 %v379_v8, %v379_v8 }
  0xf3   :  { %v383_v12 = vpop.eup %382  ;;  %266 = vst.msk [vmem:[%s548_s3 + $0x4] sm:$0xf] %vm264_vm1, %v313_v9  ;;  %v318_v13 = vpack.c.bf16 %v381_v10, %v381_v10 }
  0xf4   :  { %v385_v14 = vpop.eup %384  ;;  %274 = vst.msk [vmem:[%s548_s3 + $0x24] sm:$0xf] %vm264_vm1, %v321_v11  ;;  %v326_v15 = vpack.c.bf16 %v383_v12, %v383_v12 }
  0xf5   :  { %v387_v16 = vpop.eup %386  ;;  %271 = vst.msk [vmem:[%s548_s3 + $0x18] sm:$0xf] %vm264_vm1, %v318_v13  ;;  %v316_v17 = vpack.c.bf16 %v385_v14, %v385_v14 }
  0xf6   :  { %v389_v18 = vpop.eup %388  ;;  %279 = vst.msk [vmem:[%s548_s3 + $0x38] sm:$0xf] %vm264_vm1, %v326_v15  ;;  %v324_v19 = vpack.c.bf16 %v387_v16, %v387_v16 }
  0xf7   :  { %v391_v20 = vpop.eup %390  ;;  %269 = vst.msk [vmem:[%s548_s3 + $0x10] sm:$0xf] %vm264_vm1, %v316_v17  ;;  %v319_v21 = vpack.c.bf16 %v389_v18, %v389_v18 }
  0xf8   :  { %v393_v22 = vpop.eup %392  ;;  %277 = vst.msk [vmem:[%s548_s3 + $0x30] sm:$0xf] %vm264_vm1, %v324_v19  ;;  %v327_v23 = vpack.c.bf16 %v391_v20, %v391_v20 }
  0xf9   :  { %v395_v24 = vpop.eup %394  ;;  %272 = vst.msk [vmem:[%s548_s3 + $0x1c] sm:$0xf] %vm264_vm1, %v319_v21  ;;  %v317_v25 = vpack.c.bf16 %v393_v22, %v393_v22 }
  0xfa   :  { %280 = vst.msk [vmem:[%s548_s3 + $0x3c] sm:$0xf] %vm264_vm1, %v327_v23  ;;  %v325_v26 = vpack.c.bf16 %v395_v24, %v395_v24 }
  0xfb   :  { %270 = vst.msk [vmem:[%s548_s3 + $0x14] sm:$0xf] %vm264_vm1, %v317_v25 }
  0xfc   :  { %278 = vst.msk [vmem:[%s548_s3 + $0x34] sm:$0xf] %vm264_vm1, %v325_v26 }

</bundles_post_ra>
